<compile_context>
chip_gen: v6e
topology: v6e:2x2x1
jax: 0.10.0
libtpu: 0.0.40
codegen_flags: <defaults>
</compile_context>

<pallas_src>
import functools

import jax
import jax.numpy as jnp
from jax.experimental import pallas as pl
from jax.experimental.pallas import tpu as pltpu


def _round_up(x: int, m: int) -> int:
    return ((x + m - 1) // m) * m


def _fused_mlp_kernel(x_ref, w_ref, b_ref, o_ref, *, num_layers: int, in_dim: int,
                      matmul_dtype, precision):
    """Fused MLP: h = x; for each layer: h = relu?(h @ W_l + b_l); write final h.

    x_ref: (tm, in_dim) f32 activation tile (unpadded feature dim)
    w_ref: (L, P, P)  zero-padded weight stack (matmul_dtype)
    b_ref: (L, 1, P)  zero-padded bias stack (f32)
    o_ref: (tm, P)    output tile (lane-dense, full-width vst)
    """
    P = w_ref.shape[2]
    h = x_ref[...]                                     # (tm, in_dim) f32
    for l in range(num_layers):                        # static unroll: tiny L
        # Layer 0 contracts only over the real in_dim rows of W0; padded rows/cols of
        # later layers are exactly zero (zero weights + zero bias + ReLU(0)=0), so the
        # full-P contraction for l > 0 is exact.
        k = in_dim if l == 0 else P
        w = w_ref[l, :k, :]                            # (k, P), already matmul_dtype
        y = jnp.dot(h.astype(matmul_dtype), w,
                    preferred_element_type=jnp.float32,
                    precision=precision)
        y = y + b_ref[l]                               # f32 epilogue (bias)
        if l < num_layers - 1:
            y = jnp.maximum(y, 0.0)                    # f32 epilogue (ReLU)
        h = y
    o_ref[...] = h.astype(o_ref.dtype)                 # cast only on store


def init_dnn_params(key, input_size, hidden_size, output_size, dtype=jnp.float32):
    """Deterministic init mimicking nn.Linear's U(-1/sqrt(fan_in), 1/sqrt(fan_in)).

    Returns list of (W, b) with W shaped (in_features, out_features).
    """
    if isinstance(hidden_size, int):
        hidden_size = [hidden_size]
    sizes = [input_size] + list(hidden_size) + [output_size]
    params = []
    for fan_in, fan_out in zip(sizes[:-1], sizes[1:]):
        key, kw, kb = jax.random.split(key, 3)
        bound = 1.0 / (fan_in ** 0.5)
        w = jax.random.uniform(kw, (fan_in, fan_out), dtype=dtype,
                               minval=-bound, maxval=bound)
        b = jax.random.uniform(kb, (fan_out,), dtype=dtype,
                               minval=-bound, maxval=bound)
        params.append((w, b))
    return params


def make_dnn_forward(params, *, matmul_dtype=jnp.bfloat16, out_dtype=jnp.float32):
    """One-time prep (pad + stack weights/biases) and return a jitted forward(x).

    forward(x) matches DNN.forward (ReLU after every layer except the last) and runs
    as a single fused Pallas kernel.  out_dtype=jnp.bfloat16 halves output HBM writeback
    (useful on v5e) if downstream tolerates it.
    """
    L = len(params)
    in_dim = params[0][0].shape[0]
    out_dim = params[-1][0].shape[1]

    # Common padded feature width (lane-dense) for all layers.  Keep P = 128 for small
    # feature dims: these matmuls are latency/HBM-bound, not MXU-throughput-bound.
    sizes = [in_dim] + [w.shape[1] for (w, _) in params]
    P = _round_up(max(sizes), 128)

    # Pad + stack weights -> (L, P, P) and biases -> (L, 1, P); padded entries are zero,
    # so padded lanes stay exactly zero through matmul + bias + ReLU (no leakage).
    # Done ONCE here, outside the per-call hot path.
    w_stack = jnp.zeros((L, P, P), dtype=matmul_dtype)
    b_stack = jnp.zeros((L, 1, P), dtype=jnp.float32)
    for l, (w, b) in enumerate(params):
        w_stack = w_stack.at[l, : w.shape[0], : w.shape[1]].set(w.astype(matmul_dtype))
        b_stack = b_stack.at[l, 0, : b.shape[0]].set(b.astype(jnp.float32))
    w_stack = jax.block_until_ready(w_stack)
    b_stack = jax.block_until_ready(b_stack)

    # True-f32 MXU path for the checking mode; default (fast) path is bf16 inputs.
    precision = jax.lax.Precision.HIGHEST if matmul_dtype == jnp.float32 else None
    # bf16 packs 16 sublanes per vreg; f32 packs 8.
    sub = 16 if matmul_dtype == jnp.bfloat16 else 8

    @jax.jit
    def forward(x):
        B = x.shape[0]
        # Batch tile: aim for >= 2 grid steps (v7x megacore splits "parallel" axes over
        # its 2 TensorCores); never grow the tile past 128 (vreg pressure) — grow the
        # grid instead (per-step overhead ~0.35 us is cheaper than spilling).
        tm = min(128, max(sub, _round_up(pl.cdiv(B, 2), sub)))
        Bp = _round_up(B, tm)

        xf = x.astype(jnp.float32)
        if Bp != B:
            # Only a small batch-tail pad; the feature dim stays unpadded (in_dim wide),
            # so no 128-wide x buffer is ever written to HBM.
            xf = jnp.pad(xf, ((0, Bp - B), (0, 0)))

        kernel = functools.partial(_fused_mlp_kernel, num_layers=L, in_dim=in_dim,
                                   matmul_dtype=matmul_dtype, precision=precision)
        out_pad = pl.pallas_call(
            kernel,
            out_shape=jax.ShapeDtypeStruct((Bp, P), out_dtype),
            grid=(Bp // tm,),
            in_specs=[
                # Activation tile: last dim == full array dim (satisfies (8,128) rule).
                pl.BlockSpec((tm, in_dim), lambda i: (i, 0)),
                # Weights / biases: grid-invariant index_map -> DMA'd once, VMEM-resident.
                pl.BlockSpec((L, P, P), lambda i: (0, 0, 0)),
                pl.BlockSpec((L, 1, P), lambda i: (0, 0, 0)),
            ],
            out_specs=pl.BlockSpec((tm, P), lambda i: (i, 0)),
            compiler_params=pltpu.CompilerParams(
                dimension_semantics=("parallel",),     # v7x: split batch over 2 TCs
            ),
        )(xf, w_stack, b_stack)

        return out_pad[:B, :out_dim]

    return forward


if __name__ == "__main__":
    key = jax.random.PRNGKey(0)
    k_in, k_params = jax.random.split(key)

    # Small shapes consistent with the module: batch=8, input=16, hidden=[32, 32], output=8
    batch, input_size, hidden_size, output_size = 8, 16, [32, 32], 8

    x = jax.random.normal(k_in, (batch, input_size), dtype=jnp.float32)
    params = init_dnn_params(k_params, input_size, hidden_size, output_size)

    # Build forwards once (prep hoisted out of the hot path), then call the jitted fns.
    fwd_f32 = make_dnn_forward(params, matmul_dtype=jnp.float32)    # tight-check path
    fwd_bf16 = make_dnn_forward(params, matmul_dtype=jnp.bfloat16)  # perf default

    y_f32 = fwd_f32(x)
    y_bf16 = fwd_bf16(x)
    jax.block_until_ready((y_f32, y_bf16))

    # Plain-JAX f32 reference (same math, same params).
    ref = x
    for i, (w, b) in enumerate(params):
        ref = ref @ w + b
        if i < len(params) - 1:
            ref = jnp.maximum(ref, 0.0)

    assert y_f32.shape == (batch, output_size)
    assert y_bf16.shape == (batch, output_size)
    assert jnp.allclose(y_f32, ref, atol=1e-5, rtol=1e-5), "f32 kernel mismatch"
    assert jnp.allclose(y_bf16, ref, atol=5e-2, rtol=5e-2), "bf16 kernel mismatch"

    print("KERNEL_OK")
</pallas_src>

<mosaic_0001>
module attributes {stable_mosaic.version = 11 : i64} {
  func.func @_fused_mlp_kernel(%arg0: i32, %arg1: memref<8x16xf32, #tpu.memory_space<vmem>>, %arg2: memref<3x128x128xf32, #tpu.memory_space<vmem>>, %arg3: memref<3x1x128xf32, #tpu.memory_space<vmem>>, %arg4: memref<8x128xf32, #tpu.memory_space<vmem>>) attributes {dimension_semantics = [#tpu.dimension_semantics<parallel>], iteration_bounds = array<i64: 1>, scalar_prefetch = 0 : i64, scratch_operands = 0 : i64, tpu.core_type = #tpu.core_type<tc>, window_params = [{transform_indices = @transform_0, window_bounds = array<i64: 8, 16>}, {pipeline_mode = #tpu.pipeline_mode<synchronous>, transform_indices = @transform_1, window_bounds = array<i64: 3, 128, 128>}, {pipeline_mode = #tpu.pipeline_mode<synchronous>, transform_indices = @transform_2, window_bounds = array<i64: 3, 1, 128>}, {transform_indices = @transform_3, window_bounds = array<i64: 8, 128>}]} {
    %c0 = arith.constant 0 : index
    %c0_0 = arith.constant 0 : index
    %0 = vector.load %arg1[%c0, %c0_0] : memref<8x16xf32, #tpu.memory_space<vmem>>, vector<8x16xf32>
    %c0_1 = arith.constant 0 : index
    %c0_2 = arith.constant 0 : index
    %c0_3 = arith.constant 0 : index
    %1 = vector.load %arg2[%c0_1, %c0_2, %c0_3] : memref<3x128x128xf32, #tpu.memory_space<vmem>>, vector<1x16x128xf32>
    %2 = vector.shape_cast %1 : vector<1x16x128xf32> to vector<16x128xf32>
    %cst = arith.constant dense<0.000000e+00> : vector<8x128xf32>
    %3 = tpu.matmul %0, %2, %cst {dimension_numbers = #tpu.dot_dimension_numbers<[1], [0], [0], [1], [0, 0, 1, 1], [], []>, precision = #tpu.contract_precision<fp32>} : vector<8x16xf32>, vector<16x128xf32>, vector<8x128xf32> -> vector<8x128xf32>
    %c0_4 = arith.constant 0 : index
    %c0_5 = arith.constant 0 : index
    %c0_6 = arith.constant 0 : index
    %4 = vector.load %arg3[%c0_4, %c0_5, %c0_6] : memref<3x1x128xf32, #tpu.memory_space<vmem>>, vector<1x1x128xf32>
    %5 = vector.shape_cast %4 : vector<1x1x128xf32> to vector<1x128xf32>
    %6 = vector.broadcast %5 : vector<1x128xf32> to vector<8x128xf32>
    %7 = arith.addf %3, %6 : vector<8x128xf32>
    %cst_7 = arith.constant 0.000000e+00 : f32
    %8 = vector.broadcast %cst_7 : f32 to vector<8x128xf32>
    %9 = arith.maximumf %7, %8 : vector<8x128xf32>
    %c1 = arith.constant 1 : index
    %c0_8 = arith.constant 0 : index
    %c0_9 = arith.constant 0 : index
    %10 = vector.load %arg2[%c1, %c0_8, %c0_9] : memref<3x128x128xf32, #tpu.memory_space<vmem>>, vector<1x128x128xf32>
    %11 = vector.shape_cast %10 : vector<1x128x128xf32> to vector<128x128xf32>
    %cst_10 = arith.constant dense<0.000000e+00> : vector<8x128xf32>
    %12 = tpu.matmul %9, %11, %cst_10 {dimension_numbers = #tpu.dot_dimension_numbers<[1], [0], [0], [1], [0, 0, 1, 1], [], []>, precision = #tpu.contract_precision<fp32>} : vector<8x128xf32>, vector<128x128xf32>, vector<8x128xf32> -> vector<8x128xf32>
    %c1_11 = arith.constant 1 : index
    %c0_12 = arith.constant 0 : index
    %c0_13 = arith.constant 0 : index
    %13 = vector.load %arg3[%c1_11, %c0_12, %c0_13] : memref<3x1x128xf32, #tpu.memory_space<vmem>>, vector<1x1x128xf32>
    %14 = vector.shape_cast %13 : vector<1x1x128xf32> to vector<1x128xf32>
    %15 = vector.broadcast %14 : vector<1x128xf32> to vector<8x128xf32>
    %16 = arith.addf %12, %15 : vector<8x128xf32>
    %cst_14 = arith.constant 0.000000e+00 : f32
    %17 = vector.broadcast %cst_14 : f32 to vector<8x128xf32>
    %18 = arith.maximumf %16, %17 : vector<8x128xf32>
    %c2 = arith.constant 2 : index
    %c0_15 = arith.constant 0 : index
    %c0_16 = arith.constant 0 : index
    %19 = vector.load %arg2[%c2, %c0_15, %c0_16] : memref<3x128x128xf32, #tpu.memory_space<vmem>>, vector<1x128x128xf32>
    %20 = vector.shape_cast %19 : vector<1x128x128xf32> to vector<128x128xf32>
    %cst_17 = arith.constant dense<0.000000e+00> : vector<8x128xf32>
    %21 = tpu.matmul %18, %20, %cst_17 {dimension_numbers = #tpu.dot_dimension_numbers<[1], [0], [0], [1], [0, 0, 1, 1], [], []>, precision = #tpu.contract_precision<fp32>} : vector<8x128xf32>, vector<128x128xf32>, vector<8x128xf32> -> vector<8x128xf32>
    %c2_18 = arith.constant 2 : index
    %c0_19 = arith.constant 0 : index
    %c0_20 = arith.constant 0 : index
    %22 = vector.load %arg3[%c2_18, %c0_19, %c0_20] : memref<3x1x128xf32, #tpu.memory_space<vmem>>, vector<1x1x128xf32>
    %23 = vector.shape_cast %22 : vector<1x1x128xf32> to vector<1x128xf32>
    %24 = vector.broadcast %23 : vector<1x128xf32> to vector<8x128xf32>
    %25 = arith.addf %21, %24 : vector<8x128xf32>
    %c0_21 = arith.constant 0 : index
    %c0_22 = arith.constant 0 : index
    %26 = vector.load %arg4[%c0_21, %c0_22] : memref<8x128xf32, #tpu.memory_space<vmem>>, vector<8x128xf32>
    tpu.vector_store %arg4[%c0_21, %c0_22], %25 {strides = array<i32>} : memref<8x128xf32, #tpu.memory_space<vmem>>, vector<8x128xf32>,
    return
  }
  func.func @transform_0(%arg0: i32) -> (i32, i32) {
    %c0_i32 = arith.constant 0 : i32
    %c0_i32_0 = arith.constant 0 : i32
    return %arg0, %c0_i32 : i32, i32
  }
  func.func @transform_1(%arg0: i32) -> (i32, i32, i32) {
    %c0_i32 = arith.constant 0 : i32
    %c0_i32_0 = arith.constant 0 : i32
    %c0_i32_1 = arith.constant 0 : i32
    %c0_i32_2 = arith.constant 0 : i32
    return %c0_i32, %c0_i32_0, %c0_i32_1 : i32, i32, i32
  }
  func.func @transform_2(%arg0: i32) -> (i32, i32, i32) {
    %c0_i32 = arith.constant 0 : i32
    %c0_i32_0 = arith.constant 0 : i32
    %c0_i32_1 = arith.constant 0 : i32
    %c0_i32_2 = arith.constant 0 : i32
    return %c0_i32, %c0_i32_0, %c0_i32_1 : i32, i32, i32
  }
  func.func @transform_3(%arg0: i32) -> (i32, i32) {
    %c0_i32 = arith.constant 0 : i32
    %c0_i32_0 = arith.constant 0 : i32
    return %arg0, %c0_i32 : i32, i32
  }
}

</mosaic_0001>

<bundles_post_ra>
// kernel: forward.1
= control target key start
LH: loop header
LB: loop body
LE: loop exit
PB: predicated region body
PF: predicated region fallthrough
CT: control target
= control target key end

     0   :  { %8 = vsyncpa [#allocation3], 0  ;;  %s3432_s0 = inlined_call_operand.hbm [shape: f32[8,16], index: 0, kind: input, shape index: {}]   ;;  %s3433_s1 = inlined_call_operand.hbm [shape: f32[3,128,128], index: 1, kind: input, shape index: {}]   ;;  %s3434_s2 = inlined_call_operand.vmem [shape: f32[3,1,128], index: 2, kind: input, shape index: {}]   ;;  %s3435_s3 = inlined_call_operand.hbm [shape: f32[8,128], index: 3, kind: output, shape index: {}]  }
   0x1   :  { %9 = vsyncpa [#allocation6], 0 }
   0x2   :  { %10 = vsyncpa [#allocation4], 0  ;;  %s2627_s12 = smov [#allocation2]   ;;  %s2628_s14 = smov [#allocation5]  }
   0x3   :  { %s17_s13 = sshll.u32 %s2627_s12, 4  ;;  %s26_s15 = sshll.u32 %s2628_s14, 4  ;;  %s18_s13 = int_to_ptr.vmem [resolvable:$true] %s17_s13  ;;  %s27_s15 = int_to_ptr.vmem [resolvable:$true] %s26_s15 }
   0x4   :  { %s2569_s16 = scalar_lea.vmem %s18_s13, 128  ;;  %p2574_p1 = scmp.lt.s32.totalorder %s18_s13, %s18_s13 }
   0x5   :  { %p2570_p0 = scmp.ne.s32.totalorder %s18_s13, %s2569_s16  ;;  %p2575_p2 = scmp.lt.s32.totalorder %s2569_s16, %s2569_s16 }
   0x7   :  { %p2576_p3 = por %p2575_p2, %p2574_p1 }
   0x9   :  { %p2577_p4 = pnand %p2576_p3, %p2570_p0 }
   0xb   :  { %2580 = shalt.err (!%p2577_p4)
}
   0xc   :  { %20 = dma.hbm_to_vmem [thread:$0]  %s3432_s0, 128, %s18_s13, [#allocation3]  }
   0xd   :  { %s2589_s19 = scalar_lea.vmem %s27_s15, 6144  ;;  %p2594_p6 = scmp.lt.s32.totalorder %s27_s15, %s27_s15 }
   0xe   :  { %p2590_p5 = scmp.ne.s32.totalorder %s27_s15, %s2589_s19  ;;  %p2595_p7 = scmp.lt.s32.totalorder %s2589_s19, %s2589_s19 }
  0x10   :  { %p2596_p8 = por %p2595_p7, %p2594_p6 }
  0x12   :  { %p2597_p9 = pnand %p2596_p8, %p2590_p5 }
  0x14   :  { %2600 = shalt.err (!%p2597_p9)
}
  0x15   :  { %s2629_s20 = smov 128   ;;  %s2630_s21 = smov 8  }
  0x16   :  { %32 = dma.hbm_to_vmem [thread:$0]  %s3433_s1, 6144, %s27_s15, [#allocation6], %s2629_s20, %s2629_s20, %s2630_s21  }
  0x17   :  { %2621 = dma.done.wait [#allocation3], 128  }
  0x18   :  { %2622 = vsyncadd [#allocation3], 4294967168 }
  0x19   :  { %2623 = dma.done.wait [#allocation6], 6144  }
  0x1a   :  { %2624 = vsyncadd [#allocation6], 4294961152  ;;  %v2631_v0 = vmov 0.0   ;;  %vm2632_vm0 = vmmov 0   ;;  %vm51_vm1 = vcmask 130048   ;;  %v43_v1 = vld [vmem:[#allocation5 + $0x8] sm:$0xff] }
  0x1b   :  { %2092 = vmatprep.subr.mxu0 %v2631_v0  ;;  %2099 = vmatprep.subr.mxu1 %v2631_v0  ;;  %v42_v2 = vld [vmem:[#allocation5] sm:$0xff]  ;;  %v41_v3 = vld [vmem:[#allocation2] sm:$0xff]  ;;  %v2666_v4 = vand.u32 4294901760, %v43_v1  ;;  %v530_v14 = vld [vmem:[#allocation5 + $0xf0] sm:$0xff]  ;;  %s2633_s28 = smov [#allocation7]  }
  0x1c   :  { %2096 = vmatprep.mubr.msk.f32.mxu0 %vm2632_vm0, %v2631_v0  ;;  %2103 = vmatprep.mubr.msk.f32.mxu1 %vm2632_vm0, %v2631_v0  ;;  %v2668_v5 = vand.u32 4294901760, %v42_v2  ;;  %v53_v6 = vsel %vm51_vm1, %v41_v3, 0  ;;  %v531_v10 = vld [vmem:[#allocation5 + $0xf8] sm:$0xff]  ;;  %v529_v19 = vld [vmem:[#allocation5 + $0xe8] sm:$0xff]  ;;  %v2681_v21 = vand.u32 4294901760, %v530_v14  ;;  %v528_v24 = vld [vmem:[#allocation5 + $0xe0] sm:$0xff] }
  0x1d   :  { %v2670_v7 = vand.u32 4294901760, %v53_v6  ;;  %2093 = vmatpush3.msra.mxu0 %v2666_v4  ;;  %v162_v8 = vsub.f32 %v43_v1, %v2666_v4  ;;  %v2679_v16 = vand.u32 4294901760, %v531_v10  ;;  %v2686_v27 = vand.u32 4294901760, %v529_v19  ;;  %v527_v28 = vld [vmem:[#allocation5 + $0xd8] sm:$0xff]  ;;  %v526_v31 = vld [vmem:[#allocation5 + $0xd0] sm:$0xff]  ;;  %v525_v35 = vld [vmem:[#allocation5 + $0xc8] sm:$0xff] }
  0x1e   :  { %v169_v9 = vsub.f32 %v42_v2, %v2668_v5  ;;  %2094 = vmatprep.subr.mxu0 %v2631_v0  ;;  %v2690_v29 = vsub.f32 %v530_v14, %v2681_v21  ;;  %v2692_v30 = vand.u32 4294901760, %v528_v24  ;;  %v2700_v34 = vand.u32 4294901760, %v527_v28  ;;  %v524_v39 = vld [vmem:[#allocation5 + $0xc0] sm:$0xff]  ;;  %s1855_s29 = sshll.u32 %s2633_s28, 4  ;;  %s1856_s29 = int_to_ptr.vmem [resolvable:$true] %s1855_s29 }
  0x1f   :  { %v123_v11 = vsub.f32 %v53_v6, %v2670_v7  ;;  %2095 = vmatpush3.msra.mxu0 %v2668_v5  ;;  %v163_v12 = vand.u32 4294901760, %v162_v8  ;;  %v2684_v26 = vsub.f32 %v531_v10, %v2679_v16  ;;  %v2698_v33 = vsub.f32 %v529_v19, %v2686_v27  ;;  %v521_v10 = vld [vmem:[#allocation5 + $0xa8] sm:$0xff]  ;;  %v520_v14 = vld [vmem:[#allocation5 + $0xa0] sm:$0xff]  ;;  %s2601_s30 = scalar_lea.vmem %s1856_s29, 128  ;;  %p2606_p11 = scmp.lt.s32.totalorder %s1856_s29, %s1856_s29 }
  0x20   :  { %v170_v13 = vand.u32 4294901760, %v169_v9  ;;  %2106 = vmatprep.subr.mxu0 %v2631_v0  ;;  %v641_v36 = vand.u32 4294901760, %v2690_v29  ;;  %v2708_v37 = vsub.f32 %v528_v24, %v2692_v30  ;;  %v2710_v38 = vand.u32 4294901760, %v526_v31  ;;  %p2602_p10 = scmp.ne.s32.totalorder %s1856_s29, %s2601_s30  ;;  %p2607_p12 = scmp.lt.s32.totalorder %s2601_s30, %s2601_s30 }
  0x21   :  { %v124_v15 = vand.u32 4294901760, %v123_v11  ;;  %v164_v17 = vsub.f32 %v162_v8, %v163_v12  ;;  %v634_v32 = vand.u32 4294901760, %v2684_v26  ;;  %v648_v41 = vand.u32 4294901760, %v2698_v33 }
  0x22   :  { %v171_v18 = vsub.f32 %v169_v9, %v170_v13  ;;  %v2720_v42 = vsub.f32 %v527_v28, %v2700_v34  ;;  %v2722_v43 = vand.u32 4294901760, %v525_v35  ;;  %v642_v44 = vsub.f32 %v2690_v29, %v641_v36  ;;  %p2608_p13 = por %p2607_p12, %p2606_p11 }
  0x23   :  { %v125_v20 = vsub.f32 %v123_v11, %v124_v15  ;;  %v165_v22 = vand.u32 4294901760, %v164_v17  ;;  %v635_v40 = vsub.f32 %v2684_v26, %v634_v32  ;;  %v655_v45 = vand.u32 4294901760, %v2708_v37 }
  0x24   :  { %v172_v23 = vand.u32 4294901760, %v171_v18  ;;  %v2732_v46 = vsub.f32 %v526_v31, %v2710_v38  ;;  %v2734_v47 = vand.u32 4294901760, %v524_v39  ;;  %v649_v49 = vsub.f32 %v2698_v33, %v648_v41  ;;  %v518_v31 = vld [vmem:[#allocation5 + $0x90] sm:$0xff]  ;;  %p2609_p0 = pnand %p2608_p13, %p2602_p10 }
  0x25   :  { %v126_v25 = vand.u32 4294901760, %v125_v20  ;;  %2100 = vmatpush3.msra.mxu1 %v165_v22  ;;  %v636_v48 = vand.u32 4294901760, %v635_v40  ;;  %v662_v50 = vand.u32 4294901760, %v2720_v42  ;;  %v2745_v51 = vsub.f32 %v525_v35, %v2722_v43  ;;  %v519_v20 = vld [vmem:[#allocation5 + $0x98] sm:$0xff] }
  0x26   :  { %2101 = vmatprep.subr.mxu1 %v2631_v0  ;;  %v643_v52 = vand.u32 4294901760, %v642_v44  ;;  %v656_v53 = vsub.f32 %v2708_v37, %v655_v45  ;;  %v669_v54 = vand.u32 4294901760, %v2732_v46  ;;  %v2757_v55 = vsub.f32 %v524_v39, %v2734_v47 }
  0x27   :  { %2097 = vmatmul.mubr.f32.vlgmr.msra.gmra.mxu0 %v126_v25  ;;  %2102 = vmatpush3.msra.mxu1 %v172_v23  ;;  %v650_v56 = vand.u32 4294901760, %v649_v49  ;;  %v663_v57 = vsub.f32 %v2720_v42, %v662_v50  ;;  %v676_v58 = vand.u32 4294901760, %v2745_v51  ;;  %v2828_v19 = vand.u32 4294901760, %v520_v14  ;;  %v517_v49 = vld [vmem:[#allocation5 + $0x88] sm:$0xff] }
  0x28   :  { %2107 = vmatpush3.msra.mxu0 %v162_v8  ;;  %2104 = vmatmul.mubr.f32.vlgmr.msra.gmra.mxu1 %v2670_v7  ;;  %v657_v59 = vand.u32 4294901760, %v656_v53  ;;  %v670_v60 = vsub.f32 %v2732_v46, %v669_v54  ;;  %v683_v61 = vand.u32 4294901760, %v2757_v55  ;;  %v2840_v28 = vand.u32 4294901760, %v519_v20 }
  0x29   :  { %2108 = vmatprep.subr.mxu0 %v2631_v0  ;;  %2113 = vmatprep.subr.mxu1 %v2631_v0  ;;  %v664_v62 = vand.u32 4294901760, %v663_v57  ;;  %v677_v63 = vsub.f32 %v2745_v51, %v676_v58  ;;  %v2837_v25 = vsub.f32 %v520_v14, %v2828_v19  ;;  %v2847_v44 = vand.u32 4294901760, %v518_v31 }
  0x2a   :  { %2109 = vmatpush3.msra.mxu0 %v169_v9  ;;  %2110 = vmatprep.mubr.msk.f32.mxu0 %vm2632_vm0, %v2631_v0  ;;  %v671_v1 = vand.u32 4294901760, %v670_v60  ;;  %v684_v2 = vsub.f32 %v2757_v55, %v683_v61  ;;  %v2860_v57 = vand.u32 4294901760, %v517_v49  ;;  %v516_v60 = vld [vmem:[#allocation5 + $0x80] sm:$0xff] }
  0x2b   :  { %2114 = vmatpush3.msra.mxu1 %v2666_v4  ;;  %2111 = vmatmul.mubr.f32.vlgmr.msra.gmra.mxu0 %v123_v11  ;;  %v678_v3 = vand.u32 4294901760, %v677_v63  ;;  %v3440_v40 = vand.u32 4294901760, %v2837_v25 }
  0x2c   :  { %2115 = vmatprep.subr.mxu1 %v2631_v0  ;;  %2120 = vmatprep.subr.mxu0 %v2631_v0 }
  0x2d   :  { %2116 = vmatpush3.msra.mxu1 %v2668_v5  ;;  %2117 = vmatprep.mubr.msk.f32.mxu1 %vm2632_vm0, %v2631_v0  ;;  %v712_v53 = vsub.f32 %v2837_v25, %v3440_v40 }
  0x2e   :  { %2121 = vmatpush3.msra.mxu0 %v163_v12  ;;  %2118 = vmatmul.mubr.f32.vlgmr.msra.gmra.mxu1 %v124_v15 }
  0x2f   :  { %2122 = vmatprep.subr.mxu0 %v2631_v0  ;;  %2127 = vmatprep.subr.mxu1 %v2631_v0 }
  0x30   :  { %2123 = vmatpush3.msra.mxu0 %v170_v13  ;;  %2124 = vmatprep.mubr.msk.f32.mxu0 %vm2632_vm0, %v2631_v0  ;;  %v2817_v13 = vand.u32 4294901760, %v521_v10 }
  0x31   :  { %2128 = vmatpush3.msra.mxu1 %v2666_v4  ;;  %2125 = vmatmul.mubr.f32.vlgmr.msra.gmra.mxu0 %v2670_v7  ;;  %v685_v4 = vand.u32 4294901760, %v684_v2  ;;  %v2870_v2 = vand.u32 4294901760, %v516_v60 }
  0x32   :  { %2129 = vmatprep.subr.mxu1 %v2631_v0  ;;  %2131 = vmatprep.mubr.msk.f32.mxu1 %vm2632_vm0, %v2631_v0  ;;  %v2826_v18 = vsub.f32 %v521_v10, %v2817_v13 }
  0x33   :  { %2130 = vmatpush3.msra.mxu1 %v2668_v5  ;;  %2134 = vmatprep.subr.mxu0 %v2631_v0  ;;  %v523_v5 = vld [vmem:[#allocation5 + $0xb8] sm:$0xff] }
  0x34   :  { %2132 = vmatmul.mubr.f32.vlgmr.msra.gmra.mxu1 %v2670_v7  ;;  %2169 = vmatprep.subr.mxu1 %v2631_v0  ;;  %v2804_v6 = vand.u32 4294901760, %v523_v5  ;;  %v522_v7 = vld [vmem:[#allocation5 + $0xb0] sm:$0xff]  ;;  %v3441_v24 = vand.u32 4294901760, %v2826_v18 }
  0x35   :  { %2170 = vmatpush3.msra.mxu1 %v636_v48  ;;  %2135 = vmatpush3.msra.mxu0 %v2679_v16  ;;  %v2809_v9 = vand.u32 4294901760, %v522_v7  ;;  %v2851_v48 = vsub.f32 %v519_v20, %v2840_v28 }
  0x36   :  { %2171 = vmatprep.subr.mxu1 %v2631_v0  ;;  %2136 = vmatprep.subr.mxu0 %v2631_v0  ;;  %v2807_v8 = vsub.f32 %v523_v5, %v2804_v6  ;;  %v705_v39 = vsub.f32 %v2826_v18, %v3441_v24 }
  0x37   :  { %2172 = vmatpush3.msra.mxu1 %v643_v52  ;;  %2137 = vmatpush3.msra.mxu0 %v2681_v21  ;;  %v2815_v12 = vsub.f32 %v522_v7, %v2809_v9  ;;  %v2883_v7 = vsub.f32 %v516_v60, %v2870_v2 }
  0x38   :  { %2173 = vmatprep.subr.mxu1 %v2631_v0  ;;  %2138 = vmatprep.subr.mxu0 %v2631_v0  ;;  %v690_v11 = vand.u32 4294901760, %v2807_v8  ;;  %v706_v52 = vand.u32 4294901760, %v705_v39 }
  0x39   :  { %2174 = vmatpush3.msra.mxu1 %v650_v56  ;;  %2139 = vmatpush3.msra.mxu0 %v2686_v27  ;;  %v697_v17 = vand.u32 4294901760, %v2815_v12  ;;  %v2858_v56 = vsub.f32 %v518_v31, %v2847_v44  ;;  %v3436_v20 = vand.u32 4294901760, %v2883_v7 }
  0x3a   :  { %2175 = vmatprep.subr.mxu1 %v2631_v0  ;;  %2140 = vmatprep.subr.mxu0 %v2631_v0  ;;  %v691_v15 = vsub.f32 %v2807_v8, %v690_v11 }
  0x3b   :  { %2176 = vmatpush3.msra.mxu1 %v657_v59  ;;  %2141 = vmatpush3.msra.mxu0 %v2692_v30  ;;  %v698_v23 = vsub.f32 %v2815_v12, %v697_v17  ;;  %v3439_v59 = vand.u32 4294901760, %v2851_v48  ;;  %v3438_v63 = vand.u32 4294901760, %v2858_v56 }
  0x3c   :  { %2177 = vmatprep.subr.mxu1 %v2631_v0  ;;  %2142 = vmatprep.subr.mxu0 %v2631_v0  ;;  %v692_v22 = vand.u32 4294901760, %v691_v15 }
  0x3d   :  { %2178 = vmatpush3.msra.mxu1 %v664_v62  ;;  %2143 = vmatpush3.msra.mxu0 %v2700_v34  ;;  %v699_v35 = vand.u32 4294901760, %v698_v23  ;;  %v713_v62 = vand.u32 4294901760, %v712_v53  ;;  %v740_v23 = vsub.f32 %v2883_v7, %v3436_v20 }
  0x3e   :  { %2179 = vmatprep.subr.mxu1 %v2631_v0  ;;  %2144 = vmatprep.subr.mxu0 %v2631_v0 }
  0x3f   :  { %2180 = vmatpush3.msra.mxu1 %v671_v1  ;;  %2145 = vmatpush3.msra.mxu0 %v2710_v38  ;;  %v2868_v1 = vsub.f32 %v517_v49, %v2860_v57  ;;  %v741_v31 = vand.u32 4294901760, %v740_v23 }
  0x40   :  { %2181 = vmatprep.subr.mxu1 %v2631_v0  ;;  %2146 = vmatprep.subr.mxu0 %v2631_v0 }
  0x41   :  { %2182 = vmatpush3.msra.mxu1 %v678_v3  ;;  %2147 = vmatpush3.msra.mxu0 %v2722_v43  ;;  %v719_v3 = vsub.f32 %v2851_v48, %v3439_v59  ;;  %v3437_v5 = vand.u32 4294901760, %v2868_v1 }
  0x42   :  { %2183 = vmatprep.subr.mxu1 %v2631_v0  ;;  %2148 = vmatprep.subr.mxu0 %v2631_v0 }
  0x43   :  { %2184 = vmatpush3.msra.mxu1 %v685_v4  ;;  %2149 = vmatpush3.msra.mxu0 %v2734_v47  ;;  %v726_v4 = vsub.f32 %v2858_v56, %v3438_v63  ;;  %v720_v10 = vand.u32 4294901760, %v719_v3  ;;  %v733_v15 = vsub.f32 %v2868_v1, %v3437_v5 }
  0x44   :  { %2185 = vmatprep.subr.mxu1 %v2631_v0  ;;  %2150 = vmatprep.subr.mxu0 %v2631_v0 }
  0x45   :  { %2201 = vmatprep.mubr.msk.f32.mxu1 %vm2632_vm0, %v2631_v0  ;;  %2166 = vmatprep.mubr.msk.f32.mxu0 %vm2632_vm0, %v2631_v0  ;;  %v727_v14 = vand.u32 4294901760, %v726_v4 }
  0x46   :  { %2151 = vmatpush3.msra.mxu0 %v2804_v6  ;;  %2186 = vmatpush3.msra.mxu1 %v692_v22  ;;  %v734_v22 = vand.u32 4294901760, %v733_v15 }
  0x47   :  { %2152 = vmatprep.subr.mxu0 %v2631_v0  ;;  %2187 = vmatprep.subr.mxu1 %v2631_v0 }
  0x48   :  { %2153 = vmatpush3.msra.mxu0 %v2809_v9  ;;  %2188 = vmatpush3.msra.mxu1 %v699_v35  ;;  %v1865_v35 = vld [vmem:[%s3434_s2] ss:$0 sm:$0xff] }
  0x49   :  { %2154 = vmatprep.subr.mxu0 %v2631_v0  ;;  %2189 = vmatprep.subr.mxu1 %v2631_v0 }
  0x4a   :  { %2155 = vmatpush3.msra.mxu0 %v2817_v13  ;;  %2190 = vmatpush3.msra.mxu1 %v706_v52 }
  0x4b   :  { %2156 = vmatprep.subr.mxu0 %v2631_v0  ;;  %2191 = vmatprep.subr.mxu1 %v2631_v0 }
  0x4c   :  { %2157 = vmatpush3.msra.mxu0 %v2828_v19  ;;  %2192 = vmatpush3.msra.mxu1 %v713_v62 }
  0x4d   :  { %2158 = vmatprep.subr.mxu0 %v2631_v0  ;;  %2193 = vmatprep.subr.mxu1 %v2631_v0 }
  0x4e   :  { %2159 = vmatpush3.msra.mxu0 %v2840_v28  ;;  %2194 = vmatpush3.msra.mxu1 %v720_v10 }
  0x4f   :  { %2160 = vmatprep.subr.mxu0 %v2631_v0  ;;  %2195 = vmatprep.subr.mxu1 %v2631_v0 }
  0x50   :  { %2161 = vmatpush3.msra.mxu0 %v2847_v44  ;;  %2196 = vmatpush3.msra.mxu1 %v727_v14 }
  0x51   :  { %2162 = vmatprep.subr.mxu0 %v2631_v0  ;;  %2197 = vmatprep.subr.mxu1 %v2631_v0 }
  0x52   :  { %2163 = vmatpush3.msra.mxu0 %v2860_v57  ;;  %2198 = vmatpush3.msra.mxu1 %v734_v22 }
  0x53   :  { %2164 = vmatprep.subr.mxu0 %v2631_v0  ;;  %2199 = vmatprep.subr.mxu1 %v2631_v0 }
  0x54   :  { %2165 = vmatpush3.msra.mxu0 %v2870_v2  ;;  %2200 = vmatpush3.msra.mxu1 %v741_v31 }
  0x55   :  { %2204 = vmatprep.subr.mxu0 %v2631_v0  ;;  %2239 = vmatprep.subr.mxu1 %v2631_v0 }
  0xe7   :  { %v128_v39 = vpop.f32.mrf.mxu0 }
  0xe8   :  { %v129_v49 = vadd.f32 %v1865_v35, %v128_v39  ;;  %v209_v53 = vpop.f32.mrf.mxu1 }
  0xe9   :  { %v2098_v52 = vpop.f32.mrf.mxu0 }
  0xea   :  { %v210_v60 = vadd.f32 %v209_v53, %v129_v49  ;;  %v2105_v62 = vpop.f32.mrf.mxu1 }
  0xeb   :  { %v285_v3 = vpop.f32.mrf.mxu0  ;;  %v1190_v62 = vld [vmem:[#allocation5 + $0x138] sm:$0xff] }
  0xec   :  { %v286_v4 = vadd.f32 %v285_v3, %v210_v60 }
  0xed   :  { %v2112_v10 = vpop.f32.mrf.mxu0 }
  0xee   :  { %v360_v14 = vpop.f32.mrf.mxu1  ;;  %v3159_v10 = vand.u32 4294901760, %v1190_v62 }
  0xef   :  { %v361_v15 = vadd.f32 %v360_v14, %v286_v4  ;;  %v1189_v14 = vld [vmem:[#allocation5 + $0x130] sm:$0xff] }
  0xf0   :  { %v2119_v22 = vpop.f32.mrf.mxu1 }
  0xf1   :  { %v437_v23 = vpop.f32.mrf.mxu0  ;;  %v3165_v22 = vsub.f32 %v1190_v62, %v3159_v10 }
  0xf2   :  { %v438_v31 = vadd.f32 %v437_v23, %v361_v15  ;;  %v3167_v23 = vand.u32 4294901760, %v1189_v14 }
  0xf3   :  { %v2126_v20 = vpop.f32.mrf.mxu0 }
  0xf4   :  { %v510_v5 = vpop.f32.mrf.mxu1 }
  0xf5   :  { %v511_v63 = vadd.f32 %v510_v5, %v438_v31  ;;  %v1188_v31 = vld [vmem:[#allocation5 + $0x128] sm:$0xff] }
  0xf6   :  { %v2133_v59 = vpop.f32.mrf.mxu1 }
  0xf7   :  { %v514_v40 = vmax.f32 %v511_v63, 0.0 }
  0xf9   :  { %v2903_v24 = vand.u32 4294901760, %v514_v40 }
  0xfb   :  { %v2906_v35 = vsub.f32 %v514_v40, %v2903_v24  ;;  %2202 = vmatmul.mubr.f32.vlgmr.msra.gmra.mxu1 %v2903_v24 }
  0xfc   :  { %2240 = vmatpush3.msra.mxu1 %v2679_v16  ;;  %2271 = vmatprep.mubr.msk.f32.mxu1 %vm2632_vm0, %v2631_v0 }
  0xfd   :  { %v623_v39 = vand.u32 4294901760, %v2906_v35  ;;  %2241 = vmatprep.subr.mxu1 %v2631_v0 }
  0xfe   :  { %2242 = vmatpush3.msra.mxu1 %v2681_v21 }
  0xff   :  { %v624_v59 = vsub.f32 %v2906_v35, %v623_v39  ;;  %2243 = vmatprep.subr.mxu1 %v2631_v0 }
 0x100   :  { %2244 = vmatpush3.msra.mxu1 %v2686_v27 }
 0x101   :  { %2245 = vmatprep.subr.mxu1 %v2631_v0  ;;  %v625_v40 = vand.u32 4294901760, %v624_v59  ;;  %v3174_v59 = vsub.f32 %v1189_v14, %v3167_v23 }
 0x102   :  { %2246 = vmatpush3.msra.mxu1 %v2692_v30 }
 0x103   :  { %2247 = vmatprep.subr.mxu1 %v2631_v0  ;;  %2167 = vmatmul.mubr.f32.vlgmr.msra.gmra.mxu0 %v625_v40  ;;  %v3176_v40 = vand.u32 4294901760, %v1188_v31 }
 0x104   :  { %2205 = vmatpush3.msra.mxu0 %v2684_v26  ;;  %2248 = vmatpush3.msra.mxu1 %v2700_v34  ;;  %v3448_v26 = vand.u32 4294901760, %v2851_v48 }
 0x105   :  { %2206 = vmatprep.subr.mxu0 %v2631_v0  ;;  %2249 = vmatprep.subr.mxu1 %v2631_v0 }
 0x106   :  { %2207 = vmatpush3.msra.mxu0 %v2690_v29  ;;  %2250 = vmatpush3.msra.mxu1 %v2710_v38  ;;  %v3450_v29 = vand.u32 4294901760, %v2868_v1 }
 0x107   :  { %2208 = vmatprep.subr.mxu0 %v2631_v0  ;;  %2251 = vmatprep.subr.mxu1 %v2631_v0 }
 0x108   :  { %2209 = vmatpush3.msra.mxu0 %v2698_v33  ;;  %2252 = vmatpush3.msra.mxu1 %v2722_v43 }
 0x109   :  { %2210 = vmatprep.subr.mxu0 %v2631_v0  ;;  %2253 = vmatprep.subr.mxu1 %v2631_v0 }
 0x10a   :  { %2211 = vmatpush3.msra.mxu0 %v2708_v37  ;;  %2254 = vmatpush3.msra.mxu1 %v2734_v47 }
 0x10b   :  { %2212 = vmatprep.subr.mxu0 %v2631_v0  ;;  %2255 = vmatprep.subr.mxu1 %v2631_v0 }
 0x10c   :  { %2213 = vmatpush3.msra.mxu0 %v2720_v42  ;;  %2256 = vmatpush3.msra.mxu1 %v2804_v6  ;;  %v1194_v42 = vld [vmem:[#allocation5 + $0x158] sm:$0xff] }
 0x10d   :  { %2214 = vmatprep.subr.mxu0 %v2631_v0  ;;  %2257 = vmatprep.subr.mxu1 %v2631_v0 }
 0x10e   :  { %2215 = vmatpush3.msra.mxu0 %v2732_v46  ;;  %2258 = vmatpush3.msra.mxu1 %v2809_v9  ;;  %v3082_v46 = vand.u32 4294901760, %v1194_v42 }
 0x10f   :  { %2216 = vmatprep.subr.mxu0 %v2631_v0  ;;  %2259 = vmatprep.subr.mxu1 %v2631_v0 }
 0x110   :  { %2217 = vmatpush3.msra.mxu0 %v2745_v51  ;;  %2260 = vmatpush3.msra.mxu1 %v2817_v13  ;;  %v1191_v51 = vld [vmem:[#allocation5 + $0x140] sm:$0xff] }
 0x111   :  { %2218 = vmatprep.subr.mxu0 %v2631_v0  ;;  %2261 = vmatprep.subr.mxu1 %v2631_v0 }
 0x112   :  { %2219 = vmatpush3.msra.mxu0 %v2757_v55  ;;  %2262 = vmatpush3.msra.mxu1 %v2828_v19 }
 0x113   :  { %2220 = vmatprep.subr.mxu0 %v2631_v0  ;;  %2263 = vmatprep.subr.mxu1 %v2631_v0 }
 0x114   :  { %2221 = vmatpush3.msra.mxu0 %v2807_v8  ;;  %2264 = vmatpush3.msra.mxu1 %v2840_v28 }
 0x115   :  { %2222 = vmatprep.subr.mxu0 %v2631_v0  ;;  %2265 = vmatprep.subr.mxu1 %v2631_v0 }
 0x116   :  { %2223 = vmatpush3.msra.mxu0 %v2815_v12  ;;  %2266 = vmatpush3.msra.mxu1 %v2847_v44 }
 0x117   :  { %2224 = vmatprep.subr.mxu0 %v2631_v0  ;;  %2267 = vmatprep.subr.mxu1 %v2631_v0 }
 0x118   :  { %2225 = vmatpush3.msra.mxu0 %v2826_v18  ;;  %2268 = vmatpush3.msra.mxu1 %v2860_v57 }
 0x119   :  { %2226 = vmatprep.subr.mxu0 %v2631_v0  ;;  %2269 = vmatprep.subr.mxu1 %v2631_v0 }
 0x11a   :  { %2227 = vmatpush3.msra.mxu0 %v2837_v25  ;;  %2270 = vmatpush3.msra.mxu1 %v2870_v2 }
 0x11b   :  { %2228 = vmatprep.subr.mxu0 %v2631_v0  ;;  %2272 = vmatmul.mubr.f32.vlgmr.msra.gmra.mxu1 %v623_v39  ;;  %v1357_v39 = vand.u32 4294901760, %v3165_v22 }
 0x11c   :  { %2309 = vmatprep.subr.mxu1 %v2631_v0  ;;  %2229 = vmatpush3.msra.mxu0 %v2851_v48 }
 0x11d   :  { %2310 = vmatpush3.msra.mxu1 %v2679_v16  ;;  %2230 = vmatprep.subr.mxu0 %v2631_v0  ;;  %v3446_v16 = vand.u32 4294901760, %v2826_v18 }
 0x11e   :  { %2311 = vmatprep.subr.mxu1 %v2631_v0  ;;  %2231 = vmatpush3.msra.mxu0 %v2858_v56 }
 0x11f   :  { %2312 = vmatpush3.msra.mxu1 %v2681_v21  ;;  %2232 = vmatprep.subr.mxu0 %v2631_v0  ;;  %v3447_v21 = vand.u32 4294901760, %v2837_v25 }
 0x120   :  { %2313 = vmatprep.subr.mxu1 %v2631_v0  ;;  %2233 = vmatpush3.msra.mxu0 %v2868_v1 }
 0x121   :  { %2314 = vmatpush3.msra.mxu1 %v2686_v27  ;;  %2234 = vmatprep.subr.mxu0 %v2631_v0  ;;  %v3449_v27 = vand.u32 4294901760, %v2858_v56 }
 0x122   :  { %2315 = vmatprep.subr.mxu1 %v2631_v0  ;;  %2235 = vmatpush3.msra.mxu0 %v2883_v7 }
 0x123   :  { %2236 = vmatprep.mubr.msk.f32.mxu0 %vm2632_vm0, %v2631_v0  ;;  %2316 = vmatpush3.msra.mxu1 %v2692_v30  ;;  %v3451_v30 = vand.u32 4294901760, %v2883_v7 }
 0x124   :  { %2237 = vmatmul.mubr.f32.vlgmr.msra.gmra.mxu0 %v2906_v35  ;;  %2274 = vmatprep.subr.mxu0 %v2631_v0 }
 0x125   :  { %2317 = vmatprep.subr.mxu1 %v2631_v0  ;;  %2275 = vmatpush3.msra.mxu0 %v634_v32  ;;  %v1198_v32 = vld [vmem:[#allocation5 + $0x178] sm:$0xff] }
 0x126   :  { %2318 = vmatpush3.msra.mxu1 %v2700_v34  ;;  %2276 = vmatprep.subr.mxu0 %v2631_v0  ;;  %v3070_v33 = vand.u32 4294901760, %v1198_v32  ;;  %v1197_v34 = vld [vmem:[#allocation5 + $0x170] sm:$0xff] }
 0x127   :  { %2319 = vmatprep.subr.mxu1 %v2631_v0  ;;  %2277 = vmatpush3.msra.mxu0 %v641_v36  ;;  %v3075_v37 = vand.u32 4294901760, %v1197_v34 }
 0x128   :  { %2320 = vmatpush3.msra.mxu1 %v2710_v38  ;;  %2278 = vmatprep.subr.mxu0 %v2631_v0  ;;  %v3073_v36 = vsub.f32 %v1198_v32, %v3070_v33  ;;  %v1196_v38 = vld [vmem:[#allocation5 + $0x168] sm:$0xff] }
 0x129   :  { %2321 = vmatprep.subr.mxu1 %v2631_v0  ;;  %2279 = vmatpush3.msra.mxu0 %v648_v41  ;;  %v1195_v41 = vld [vmem:[#allocation5 + $0x160] sm:$0xff]  ;;  %v3087_v55 = vsub.f32 %v1197_v34, %v3075_v37 }
 0x12a   :  { %2322 = vmatpush3.msra.mxu1 %v2722_v43  ;;  %2280 = vmatprep.subr.mxu0 %v2631_v0  ;;  %v3078_v43 = vand.u32 4294901760, %v1196_v38 }
 0x12b   :  { %2323 = vmatprep.subr.mxu1 %v2631_v0  ;;  %2281 = vmatpush3.msra.mxu0 %v655_v45  ;;  %v3080_v45 = vand.u32 4294901760, %v1195_v41 }
 0x12c   :  { %2324 = vmatpush3.msra.mxu1 %v2734_v47  ;;  %2282 = vmatprep.subr.mxu0 %v2631_v0  ;;  %v1193_v47 = vld [vmem:[#allocation5 + $0x150] sm:$0xff] }
 0x12d   :  { %2325 = vmatprep.subr.mxu1 %v2631_v0  ;;  %2283 = vmatpush3.msra.mxu0 %v662_v50  ;;  %v1192_v50 = vld [vmem:[#allocation5 + $0x148] sm:$0xff]  ;;  %v3098_v8 = vsub.f32 %v1195_v41, %v3080_v45 }
 0x12e   :  { %2326 = vmatpush3.msra.mxu1 %v2804_v6  ;;  %2284 = vmatprep.subr.mxu0 %v2631_v0  ;;  %v3095_v6 = vsub.f32 %v1196_v38, %v3078_v43 }
 0x12f   :  { %2327 = vmatprep.subr.mxu1 %v2631_v0  ;;  %2285 = vmatpush3.msra.mxu0 %v669_v54  ;;  %v1301_v54 = vand.u32 4294901760, %v3073_v36 }
 0x130   :  { %2328 = vmatpush3.msra.mxu1 %v2809_v9  ;;  %2286 = vmatprep.subr.mxu0 %v2631_v0  ;;  %v3101_v9 = vsub.f32 %v1194_v42, %v3082_v46 }
 0x131   :  { %2329 = vmatprep.subr.mxu1 %v2631_v0  ;;  %2287 = vmatpush3.msra.mxu0 %v676_v58  ;;  %v3090_v58 = vand.u32 4294901760, %v1193_v47  ;;  %v1302_v12 = vsub.f32 %v3073_v36, %v1301_v54 }
 0x132   :  { %2330 = vmatpush3.msra.mxu1 %v2817_v13  ;;  %2288 = vmatprep.subr.mxu0 %v2631_v0  ;;  %v1308_v13 = vand.u32 4294901760, %v3087_v55  ;;  %v1329_v25 = vand.u32 4294901760, %v3101_v9 }
 0x133   :  { %2331 = vmatprep.subr.mxu1 %v2631_v0  ;;  %2289 = vmatpush3.msra.mxu0 %v683_v61  ;;  %v3092_v61 = vand.u32 4294901760, %v1192_v50 }
 0x134   :  { %2332 = vmatpush3.msra.mxu1 %v2828_v19  ;;  %2290 = vmatprep.subr.mxu0 %v2631_v0  ;;  %v1315_v19 = vand.u32 4294901760, %v3095_v6 }
 0x135   :  { %2333 = vmatprep.subr.mxu1 %v2631_v0  ;;  %2291 = vmatpush3.msra.mxu0 %v690_v11  ;;  %v3104_v11 = vand.u32 4294901760, %v1191_v51  ;;  %v3115_v18 = vsub.f32 %v1192_v50, %v3092_v61 }
 0x136   :  { %2334 = vmatpush3.msra.mxu1 %v2840_v28  ;;  %2292 = vmatprep.subr.mxu0 %v2631_v0  ;;  %v1303_v28 = vand.u32 4294901760, %v1302_v12 }
 0x137   :  { %2335 = vmatprep.subr.mxu1 %v2631_v0  ;;  %2293 = vmatpush3.msra.mxu0 %v697_v17  ;;  %v3111_v17 = vsub.f32 %v1193_v47, %v3090_v58  ;;  %v3127_v56 = vsub.f32 %v1191_v51, %v3104_v11  ;;  %v1343_v5 = vand.u32 4294901760, %v3115_v18  ;;  %v1185_v47 = vld [vmem:[#allocation5 + $0x110] sm:$0xff] }
 0x138   :  { %2336 = vmatpush3.msra.mxu1 %v2847_v44  ;;  %2294 = vmatprep.subr.mxu0 %v2631_v0  ;;  %v1309_v44 = vsub.f32 %v3087_v55, %v1308_v13 }
 0x139   :  { %2337 = vmatprep.subr.mxu1 %v2631_v0  ;;  %2295 = vmatpush3.msra.mxu0 %v3446_v16  ;;  %v1336_v48 = vand.u32 4294901760, %v3111_v17  ;;  %v1350_v52 = vand.u32 4294901760, %v3127_v56  ;;  %v1344_v60 = vsub.f32 %v3115_v18, %v1343_v5  ;;  %v1187_v16 = vld [vmem:[#allocation5 + $0x120] sm:$0xff] }
 0x13a   :  { %2338 = vmatpush3.msra.mxu1 %v2860_v57  ;;  %2296 = vmatprep.subr.mxu0 %v2631_v0  ;;  %v1316_v57 = vsub.f32 %v3095_v6, %v1315_v19  ;;  %v1310_v1 = vand.u32 4294901760, %v1309_v44 }
 0x13b   :  { %2339 = vmatprep.subr.mxu1 %v2631_v0  ;;  %2297 = vmatpush3.msra.mxu0 %v3447_v21  ;;  %v1337_v49 = vsub.f32 %v3111_v17, %v1336_v48  ;;  %v1351_v4 = vsub.f32 %v3127_v56, %v1350_v52  ;;  %v1345_v15 = vand.u32 4294901760, %v1344_v60  ;;  %v1358_v21 = vsub.f32 %v3165_v22, %v1357_v39 }
 0x13c   :  { %2340 = vmatpush3.msra.mxu1 %v2870_v2  ;;  %2341 = vmatprep.mubr.msk.f32.mxu1 %vm2632_vm0, %v2631_v0  ;;  %v1330_v2 = vsub.f32 %v3101_v9, %v1329_v25  ;;  %v1317_v7 = vand.u32 4294901760, %v1316_v57  ;;  %v1184_v57 = vld [vmem:[#allocation5 + $0x108] sm:$0xff] }
 0x13d   :  { %2298 = vmatprep.subr.mxu0 %v2631_v0  ;;  %2342 = vmatmul.mubr.f32.vlgmr.msra.gmra.mxu1 %v2903_v24  ;;  %v1338_v3 = vand.u32 4294901760, %v1337_v49  ;;  %v1352_v35 = vand.u32 4294901760, %v1351_v4  ;;  %v1359_v32 = vand.u32 4294901760, %v1358_v21  ;;  %v1183_v49 = vld [vmem:[#allocation5 + $0x100] sm:$0xff] }
 0x13e   :  { %2299 = vmatpush3.msra.mxu0 %v3448_v26  ;;  %2306 = vmatprep.mubr.msk.f32.mxu0 %vm2632_vm0, %v2631_v0  ;;  %v1331_v53 = vand.u32 4294901760, %v1330_v2  ;;  %v1364_v26 = vand.u32 4294901760, %v3174_v59 }
 0x13f   :  { %2300 = vmatprep.subr.mxu0 %v2631_v0  ;;  %2379 = vmatprep.subr.mxu1 %v2631_v0 }
 0x140   :  { %2301 = vmatpush3.msra.mxu0 %v3449_v27  ;;  %2411 = vmatprep.mubr.msk.f32.mxu1 %vm2632_vm0, %v2631_v0  ;;  %v3186_v27 = vsub.f32 %v1188_v31, %v3176_v40  ;;  %v1365_v34 = vsub.f32 %v3174_v59, %v1364_v26 }
 0x141   :  { %2302 = vmatprep.subr.mxu0 %v2631_v0  ;;  %2380 = vmatpush3.msra.mxu1 %v1303_v28  ;;  %v3209_v28 = vand.u32 4294901760, %v1185_v47 }
 0x142   :  { %2303 = vmatpush3.msra.mxu0 %v3450_v29  ;;  %2381 = vmatprep.subr.mxu1 %v2631_v0  ;;  %v3188_v29 = vand.u32 4294901760, %v1187_v16  ;;  %v1371_v38 = vand.u32 4294901760, %v3186_v27  ;;  %v1366_v50 = vand.u32 4294901760, %v1365_v34 }
 0x143   :  { %2304 = vmatprep.subr.mxu0 %v2631_v0  ;;  %2382 = vmatpush3.msra.mxu1 %v1310_v1  ;;  %v3220_v2 = vsub.f32 %v1185_v47, %v3209_v28 }
 0x144   :  { %2305 = vmatpush3.msra.mxu0 %v3451_v30  ;;  %2383 = vmatprep.subr.mxu1 %v2631_v0  ;;  %v1186_v30 = vld [vmem:[#allocation5 + $0x118] sm:$0xff]  ;;  %v3198_v41 = vsub.f32 %v1187_v16, %v3188_v29  ;;  %v1372_v51 = vsub.f32 %v3186_v27, %v1371_v38 }
 0x145   :  { %2307 = vmatmul.mubr.f32.vlgmr.msra.gmra.mxu0 %v2903_v24  ;;  %2344 = vmatprep.subr.mxu0 %v2631_v0  ;;  %v1322_v24 = vand.u32 4294901760, %v3098_v8  ;;  %v3202_v42 = vand.u32 4294901760, %v1186_v30  ;;  %v3444_v60 = vand.u32 4294901760, %v3220_v2 }
 0x146   :  { %2376 = vmatprep.mubr.msk.f32.mxu0 %vm2632_vm0, %v2631_v0  ;;  %2345 = vmatpush3.msra.mxu0 %v3070_v33  ;;  %v1378_v12 = vand.u32 4294901760, %v3198_v41 }
 0x147   :  { %2346 = vmatprep.subr.mxu0 %v2631_v0  ;;  %v1323_v63 = vsub.f32 %v3098_v8, %v1322_v24  ;;  %2384 = vmatpush3.msra.mxu1 %v1317_v7  ;;  %v3213_v44 = vsub.f32 %v1186_v30, %v3202_v42  ;;  %v3222_v7 = vand.u32 4294901760, %v1184_v57  ;;  %v1393_v14 = vsub.f32 %v3220_v2, %v3444_v60 }
 0x148   :  { %2347 = vmatpush3.msra.mxu0 %v3075_v37  ;;  %2385 = vmatprep.subr.mxu1 %v2631_v0  ;;  %v1379_v1 = vsub.f32 %v3198_v41, %v1378_v12 }
 0x149   :  { %2348 = vmatprep.subr.mxu0 %v2631_v0  ;;  %v1324_v20 = vand.u32 4294901760, %v1323_v63  ;;  %v1373_v63 = vand.u32 4294901760, %v1372_v51  ;;  %v3230_v62 = vsub.f32 %v1184_v57, %v3222_v7  ;;  %v1394_v16 = vand.u32 4294901760, %v1393_v14  ;;  %v1867_v14 = vld [vmem:[%s3434_s2 + $0x1] ss:$0 sm:$0xff] }
 0x14a   :  { %2349 = vmatpush3.msra.mxu0 %v3078_v43 }
 0x14b   :  { %2350 = vmatprep.subr.mxu0 %v2631_v0  ;;  %2386 = vmatpush3.msra.mxu1 %v1324_v20  ;;  %v3445_v20 = vand.u32 4294901760, %v3213_v44 }
 0x14c   :  { %2351 = vmatpush3.msra.mxu0 %v3080_v45  ;;  %2387 = vmatprep.subr.mxu1 %v2631_v0 }
 0x14d   :  { %2352 = vmatprep.subr.mxu0 %v2631_v0  ;;  %2388 = vmatpush3.msra.mxu1 %v1331_v53  ;;  %v1380_v53 = vand.u32 4294901760, %v1379_v1  ;;  %v1386_v4 = vsub.f32 %v3213_v44, %v3445_v20 }
 0x14e   :  { %2353 = vmatpush3.msra.mxu0 %v3082_v46  ;;  %2389 = vmatprep.subr.mxu1 %v2631_v0 }
 0x14f   :  { %2354 = vmatprep.subr.mxu0 %v2631_v0  ;;  %2390 = vmatpush3.msra.mxu1 %v1338_v3  ;;  %v3232_v3 = vand.u32 4294901760, %v1183_v49 }
 0x150   :  { %2355 = vmatpush3.msra.mxu0 %v3090_v58  ;;  %2391 = vmatprep.subr.mxu1 %v2631_v0 }
 0x151   :  { %2356 = vmatprep.subr.mxu0 %v2631_v0  ;;  %2392 = vmatpush3.msra.mxu1 %v1345_v15  ;;  %v3443_v15 = vand.u32 4294901760, %v3230_v62  ;;  %v3245_v31 = vsub.f32 %v1183_v49, %v3232_v3 }
 0x152   :  { %2357 = vmatpush3.msra.mxu0 %v3092_v61  ;;  %2393 = vmatprep.subr.mxu1 %v2631_v0 }
 0x153   :  { %2358 = vmatprep.subr.mxu0 %v2631_v0  ;;  %2394 = vmatpush3.msra.mxu1 %v1352_v35  ;;  %v1387_v35 = vand.u32 4294901760, %v1386_v4  ;;  %v1400_v21 = vsub.f32 %v3230_v62, %v3443_v15  ;;  %v3442_v30 = vand.u32 4294901760, %v3245_v31 }
 0x154   :  { %2359 = vmatpush3.msra.mxu0 %v3104_v11  ;;  %2395 = vmatprep.subr.mxu1 %v2631_v0 }
 0x155   :  { %2360 = vmatprep.subr.mxu0 %v2631_v0  ;;  %2396 = vmatpush3.msra.mxu1 %v1359_v32  ;;  %v1401_v32 = vand.u32 4294901760, %v1400_v21  ;;  %v1407_v34 = vsub.f32 %v3245_v31, %v3442_v30 }
 0x156   :  { %2361 = vmatpush3.msra.mxu0 %v3159_v10  ;;  %2397 = vmatprep.subr.mxu1 %v2631_v0 }
 0x157   :  { %2362 = vmatprep.subr.mxu0 %v2631_v0  ;;  %2398 = vmatpush3.msra.mxu1 %v1366_v50  ;;  %v1408_v47 = vand.u32 4294901760, %v1407_v34 }
 0x158   :  { %2363 = vmatpush3.msra.mxu0 %v3167_v23  ;;  %2399 = vmatprep.subr.mxu1 %v2631_v0 }
 0x159   :  { %2364 = vmatprep.subr.mxu0 %v2631_v0  ;;  %2400 = vmatpush3.msra.mxu1 %v1373_v63 }
 0x15a   :  { %2365 = vmatpush3.msra.mxu0 %v3176_v40  ;;  %2401 = vmatprep.subr.mxu1 %v2631_v0 }
 0x15b   :  { %2366 = vmatprep.subr.mxu0 %v2631_v0  ;;  %2402 = vmatpush3.msra.mxu1 %v1380_v53 }
 0x15c   :  { %2367 = vmatpush3.msra.mxu0 %v3188_v29  ;;  %2403 = vmatprep.subr.mxu1 %v2631_v0 }
 0x15d   :  { %2368 = vmatprep.subr.mxu0 %v2631_v0  ;;  %2404 = vmatpush3.msra.mxu1 %v1387_v35 }
 0x15e   :  { %2369 = vmatpush3.msra.mxu0 %v3202_v42  ;;  %2405 = vmatprep.subr.mxu1 %v2631_v0 }
 0x15f   :  { %2370 = vmatprep.subr.mxu0 %v2631_v0  ;;  %2406 = vmatpush3.msra.mxu1 %v1394_v16 }
 0x160   :  { %2371 = vmatpush3.msra.mxu0 %v3209_v28  ;;  %2407 = vmatprep.subr.mxu1 %v2631_v0 }
 0x161   :  { %2372 = vmatprep.subr.mxu0 %v2631_v0  ;;  %2408 = vmatpush3.msra.mxu1 %v1401_v32 }
 0x162   :  { %2373 = vmatpush3.msra.mxu0 %v3222_v7  ;;  %2409 = vmatprep.subr.mxu1 %v2631_v0 }
 0x163   :  { %2374 = vmatprep.subr.mxu0 %v2631_v0  ;;  %2410 = vmatpush3.msra.mxu1 %v1408_v47 }
 0x164   :  { %2375 = vmatpush3.msra.mxu0 %v3232_v3  ;;  %2449 = vmatprep.subr.mxu1 %v2631_v0 }
 0x165   :  { %2414 = vmatprep.subr.mxu0 %v2631_v0 }
 0x1bb   :  { %v778_v50 = vpop.f32.mrf.mxu1 }
 0x1bd   :  { %v2203_v51 = vpop.f32.mrf.mxu1 }
 0x1c3   :  { %v627_v57 = vpop.f32.mrf.mxu0 }
 0x1c4   :  { %v628_v35 = vadd.f32 %v1867_v14, %v627_v57 }
 0x1c5   :  { %v2168_v63 = vpop.f32.mrf.mxu0 }
 0x1c6   :  { %v779_v21 = vadd.f32 %v778_v50, %v628_v35 }
 0x1db   :  { %v971_v1 = vpop.f32.mrf.mxu1 }
 0x1dd   :  { %v2273_v49 = vpop.f32.mrf.mxu1 }
 0x1e4   :  { %v882_v53 = vpop.f32.mrf.mxu0 }
 0x1e5   :  { %v883_v34 = vadd.f32 %v882_v53, %v779_v21 }
 0x1e6   :  { %v2238_v4 = vpop.f32.mrf.mxu0 }
 0x1e7   :  { %v972_v47 = vadd.f32 %v971_v1, %v883_v34 }
 0x1fd   :  { %v1177_v16 = vpop.f32.mrf.mxu1 }
 0x1ff   :  { %v2343_v32 = vpop.f32.mrf.mxu1 }
 0x205   :  { %v1090_v30 = vpop.f32.mrf.mxu0 }
 0x206   :  { %v1091_v15 = vadd.f32 %v1090_v30, %v972_v47 }
 0x207   :  { %v2308_v60 = vpop.f32.mrf.mxu0 }
 0x208   :  { %v1178_v51 = vadd.f32 %v1177_v16, %v1091_v15 }
 0x20a   :  { %v1181_v20 = vmax.f32 %v1178_v51, 0.0 }
 0x20c   :  { %v3265_v63 = vand.u32 4294901760, %v1181_v20 }
 0x20e   :  { %v3268_v49 = vsub.f32 %v1181_v20, %v3265_v63  ;;  %2412 = vmatmul.mubr.f32.vlgmr.msra.gmra.mxu1 %v3265_v63 }
 0x20f   :  { %2450 = vmatpush3.msra.mxu1 %v3070_v33  ;;  %2481 = vmatprep.mubr.msk.f32.mxu1 %vm2632_vm0, %v2631_v0 }
 0x210   :  { %v1290_v50 = vand.u32 4294901760, %v3268_v49  ;;  %2451 = vmatprep.subr.mxu1 %v2631_v0 }
 0x211   :  { %2452 = vmatpush3.msra.mxu1 %v3075_v37 }
 0x212   :  { %2453 = vmatprep.subr.mxu1 %v2631_v0  ;;  %v1291_v60 = vsub.f32 %v3268_v49, %v1290_v50 }
 0x213   :  { %2454 = vmatpush3.msra.mxu1 %v3078_v43 }
 0x214   :  { %2455 = vmatprep.subr.mxu1 %v2631_v0  ;;  %v1292_v20 = vand.u32 4294901760, %v1291_v60 }
 0x215   :  { %2456 = vmatpush3.msra.mxu1 %v3080_v45 }
 0x216   :  { %2457 = vmatprep.subr.mxu1 %v2631_v0  ;;  %2377 = vmatmul.mubr.f32.vlgmr.msra.gmra.mxu0 %v1292_v20 }
 0x217   :  { %2415 = vmatpush3.msra.mxu0 %v3073_v36  ;;  %2458 = vmatpush3.msra.mxu1 %v3082_v46  ;;  %v3453_v36 = vand.u32 4294901760, %v3220_v2 }
 0x218   :  { %2416 = vmatprep.subr.mxu0 %v2631_v0  ;;  %2459 = vmatprep.subr.mxu1 %v2631_v0 }
 0x219   :  { %2417 = vmatpush3.msra.mxu0 %v3087_v55  ;;  %2460 = vmatpush3.msra.mxu1 %v3090_v58 }
 0x21a   :  { %2418 = vmatprep.subr.mxu0 %v2631_v0  ;;  %2461 = vmatprep.subr.mxu1 %v2631_v0 }
 0x21b   :  { %2419 = vmatpush3.msra.mxu0 %v3095_v6  ;;  %2462 = vmatpush3.msra.mxu1 %v3092_v61 }
 0x21c   :  { %2420 = vmatprep.subr.mxu0 %v2631_v0  ;;  %2463 = vmatprep.subr.mxu1 %v2631_v0 }
 0x21d   :  { %2421 = vmatpush3.msra.mxu0 %v3098_v8  ;;  %2464 = vmatpush3.msra.mxu1 %v3104_v11 }
 0x21e   :  { %2422 = vmatprep.subr.mxu0 %v2631_v0  ;;  %2465 = vmatprep.subr.mxu1 %v2631_v0 }
 0x21f   :  { %2423 = vmatpush3.msra.mxu0 %v3101_v9  ;;  %2466 = vmatpush3.msra.mxu1 %v3159_v10  ;;  %v1869_v9 = vld [vmem:[%s3434_s2 + $0x2] ss:$0 sm:$0xff] }
 0x220   :  { %2424 = vmatprep.subr.mxu0 %v2631_v0  ;;  %2467 = vmatprep.subr.mxu1 %v2631_v0 }
 0x221   :  { %2425 = vmatpush3.msra.mxu0 %v3111_v17  ;;  %2468 = vmatpush3.msra.mxu1 %v3167_v23 }
 0x222   :  { %2426 = vmatprep.subr.mxu0 %v2631_v0  ;;  %2469 = vmatprep.subr.mxu1 %v2631_v0 }
 0x223   :  { %2427 = vmatpush3.msra.mxu0 %v3115_v18  ;;  %2470 = vmatpush3.msra.mxu1 %v3176_v40 }
 0x224   :  { %2428 = vmatprep.subr.mxu0 %v2631_v0  ;;  %2471 = vmatprep.subr.mxu1 %v2631_v0 }
 0x225   :  { %2429 = vmatpush3.msra.mxu0 %v3127_v56  ;;  %2472 = vmatpush3.msra.mxu1 %v3188_v29 }
 0x226   :  { %2430 = vmatprep.subr.mxu0 %v2631_v0  ;;  %2473 = vmatprep.subr.mxu1 %v2631_v0 }
 0x227   :  { %2431 = vmatpush3.msra.mxu0 %v3165_v22  ;;  %2474 = vmatpush3.msra.mxu1 %v3202_v42 }
 0x228   :  { %2432 = vmatprep.subr.mxu0 %v2631_v0  ;;  %2475 = vmatprep.subr.mxu1 %v2631_v0 }
 0x229   :  { %2433 = vmatpush3.msra.mxu0 %v3174_v59  ;;  %2476 = vmatpush3.msra.mxu1 %v3209_v28 }
 0x22a   :  { %2434 = vmatprep.subr.mxu0 %v2631_v0  ;;  %2477 = vmatprep.subr.mxu1 %v2631_v0 }
 0x22b   :  { %2435 = vmatpush3.msra.mxu0 %v3186_v27  ;;  %2478 = vmatpush3.msra.mxu1 %v3222_v7 }
 0x22c   :  { %2436 = vmatprep.subr.mxu0 %v2631_v0  ;;  %2479 = vmatprep.subr.mxu1 %v2631_v0 }
 0x22d   :  { %2437 = vmatpush3.msra.mxu0 %v3198_v41  ;;  %2480 = vmatpush3.msra.mxu1 %v3232_v3 }
 0x22e   :  { %2438 = vmatprep.subr.mxu0 %v2631_v0  ;;  %2482 = vmatmul.mubr.f32.vlgmr.msra.gmra.mxu1 %v1290_v50 }
 0x22f   :  { %2519 = vmatprep.subr.mxu1 %v2631_v0  ;;  %2439 = vmatpush3.msra.mxu0 %v3213_v44 }
 0x230   :  { %2520 = vmatpush3.msra.mxu1 %v3070_v33  ;;  %2440 = vmatprep.subr.mxu0 %v2631_v0  ;;  %v3452_v33 = vand.u32 4294901760, %v3213_v44 }
 0x231   :  { %2521 = vmatprep.subr.mxu1 %v2631_v0  ;;  %2441 = vmatpush3.msra.mxu0 %v3220_v2 }
 0x232   :  { %2522 = vmatpush3.msra.mxu1 %v3075_v37  ;;  %2442 = vmatprep.subr.mxu0 %v2631_v0  ;;  %v3454_v37 = vand.u32 4294901760, %v3230_v62 }
 0x233   :  { %2523 = vmatprep.subr.mxu1 %v2631_v0  ;;  %2443 = vmatpush3.msra.mxu0 %v3230_v62 }
 0x234   :  { %2524 = vmatpush3.msra.mxu1 %v3078_v43  ;;  %2444 = vmatprep.subr.mxu0 %v2631_v0  ;;  %v3455_v43 = vand.u32 4294901760, %v3245_v31 }
 0x235   :  { %2525 = vmatprep.subr.mxu1 %v2631_v0  ;;  %2445 = vmatpush3.msra.mxu0 %v3245_v31 }
 0x236   :  { %2446 = vmatprep.mubr.msk.f32.mxu0 %vm2632_vm0, %v2631_v0  ;;  %2526 = vmatpush3.msra.mxu1 %v3080_v45 }
 0x237   :  { %2447 = vmatmul.mubr.f32.vlgmr.msra.gmra.mxu0 %v3268_v49  ;;  %2484 = vmatprep.subr.mxu0 %v2631_v0 }
 0x238   :  { %2527 = vmatprep.subr.mxu1 %v2631_v0  ;;  %2485 = vmatpush3.msra.mxu0 %v1301_v54 }
 0x239   :  { %2528 = vmatpush3.msra.mxu1 %v3082_v46  ;;  %2486 = vmatprep.subr.mxu0 %v2631_v0 }
 0x23a   :  { %2529 = vmatprep.subr.mxu1 %v2631_v0  ;;  %2487 = vmatpush3.msra.mxu0 %v1308_v13 }
 0x23b   :  { %2530 = vmatpush3.msra.mxu1 %v3090_v58  ;;  %2488 = vmatprep.subr.mxu0 %v2631_v0 }
 0x23c   :  { %2531 = vmatprep.subr.mxu1 %v2631_v0  ;;  %2489 = vmatpush3.msra.mxu0 %v1315_v19 }
 0x23d   :  { %2532 = vmatpush3.msra.mxu1 %v3092_v61  ;;  %2490 = vmatprep.subr.mxu0 %v2631_v0 }
 0x23e   :  { %2533 = vmatprep.subr.mxu1 %v2631_v0  ;;  %2491 = vmatpush3.msra.mxu0 %v1322_v24 }
 0x23f   :  { %2534 = vmatpush3.msra.mxu1 %v3104_v11  ;;  %2492 = vmatprep.subr.mxu0 %v2631_v0 }
 0x240   :  { %2535 = vmatprep.subr.mxu1 %v2631_v0  ;;  %2493 = vmatpush3.msra.mxu0 %v1329_v25 }
 0x241   :  { %2536 = vmatpush3.msra.mxu1 %v3159_v10  ;;  %2494 = vmatprep.subr.mxu0 %v2631_v0 }
 0x242   :  { %2537 = vmatprep.subr.mxu1 %v2631_v0  ;;  %2495 = vmatpush3.msra.mxu0 %v1336_v48 }
 0x243   :  { %2538 = vmatpush3.msra.mxu1 %v3167_v23  ;;  %2496 = vmatprep.subr.mxu0 %v2631_v0 }
 0x244   :  { %2539 = vmatprep.subr.mxu1 %v2631_v0  ;;  %2497 = vmatpush3.msra.mxu0 %v1343_v5 }
 0x245   :  { %2540 = vmatpush3.msra.mxu1 %v3176_v40  ;;  %2498 = vmatprep.subr.mxu0 %v2631_v0 }
 0x246   :  { %2541 = vmatprep.subr.mxu1 %v2631_v0  ;;  %2499 = vmatpush3.msra.mxu0 %v1350_v52 }
 0x247   :  { %2542 = vmatpush3.msra.mxu1 %v3188_v29  ;;  %2500 = vmatprep.subr.mxu0 %v2631_v0 }
 0x248   :  { %2543 = vmatprep.subr.mxu1 %v2631_v0  ;;  %2501 = vmatpush3.msra.mxu0 %v1357_v39 }
 0x249   :  { %2544 = vmatpush3.msra.mxu1 %v3202_v42  ;;  %2502 = vmatprep.subr.mxu0 %v2631_v0 }
 0x24a   :  { %2545 = vmatprep.subr.mxu1 %v2631_v0  ;;  %2503 = vmatpush3.msra.mxu0 %v1364_v26 }
 0x24b   :  { %2546 = vmatpush3.msra.mxu1 %v3209_v28  ;;  %2504 = vmatprep.subr.mxu0 %v2631_v0 }
 0x24c   :  { %2547 = vmatprep.subr.mxu1 %v2631_v0  ;;  %2505 = vmatpush3.msra.mxu0 %v1371_v38 }
 0x24d   :  { %2548 = vmatpush3.msra.mxu1 %v3222_v7  ;;  %2506 = vmatprep.subr.mxu0 %v2631_v0 }
 0x24e   :  { %2549 = vmatprep.subr.mxu1 %v2631_v0  ;;  %2507 = vmatpush3.msra.mxu0 %v1378_v12 }
 0x24f   :  { %2550 = vmatpush3.msra.mxu1 %v3232_v3  ;;  %2551 = vmatprep.mubr.msk.f32.mxu1 %vm2632_vm0, %v2631_v0 }
 0x250   :  { %2508 = vmatprep.subr.mxu0 %v2631_v0  ;;  %2552 = vmatmul.mubr.f32.vlgmr.msra.gmra.mxu1 %v3265_v63 }
 0x251   :  { %2509 = vmatpush3.msra.mxu0 %v3452_v33  ;;  %2516 = vmatprep.mubr.msk.f32.mxu0 %vm2632_vm0, %v2631_v0 }
 0x252   :  { %2510 = vmatprep.subr.mxu0 %v2631_v0 }
 0x253   :  { %2511 = vmatpush3.msra.mxu0 %v3453_v36 }
 0x254   :  { %2512 = vmatprep.subr.mxu0 %v2631_v0 }
 0x255   :  { %2513 = vmatpush3.msra.mxu0 %v3454_v37 }
 0x256   :  { %2514 = vmatprep.subr.mxu0 %v2631_v0 }
 0x257   :  { %2515 = vmatpush3.msra.mxu0 %v3455_v43 }
 0x258   :  { %2517 = vmatmul.mubr.f32.vlgmr.msra.gmra.mxu0 %v3265_v63 }
 0x2ce   :  { %v1445_v45 = vpop.f32.mrf.mxu1 }
 0x2d0   :  { %v2413_v46 = vpop.f32.mrf.mxu1 }
 0x2d6   :  { %v1294_v54 = vpop.f32.mrf.mxu0 }
 0x2d7   :  { %v1295_v11 = vadd.f32 %v1869_v9, %v1294_v54 }
 0x2d8   :  { %v2378_v55 = vpop.f32.mrf.mxu0 }
 0x2d9   :  { %v1446_v0 = vadd.f32 %v1445_v45, %v1295_v11 }
 0x2ee   :  { %v1638_v58 = vpop.f32.mrf.mxu1 }
 0x2f0   :  { %v2483_v61 = vpop.f32.mrf.mxu1 }
 0x2f7   :  { %v1549_v6 = vpop.f32.mrf.mxu0 }
 0x2f8   :  { %v1550_v18 = vadd.f32 %v1549_v6, %v1446_v0 }
 0x2f9   :  { %v2448_v8 = vpop.f32.mrf.mxu0 }
 0x2fa   :  { %v1639_v19 = vadd.f32 %v1638_v58, %v1550_v18 }
 0x310   :  { %v1844_v13 = vpop.f32.mrf.mxu1 }
 0x312   :  { %v2553_v17 = vpop.f32.mrf.mxu1 }
 0x318   :  { %v1757_v24 = vpop.f32.mrf.mxu0 }
 0x319   :  { %v1758_v25 = vadd.f32 %v1757_v24, %v1639_v19 }
 0x31a   :  { %v2518_v48 = vpop.f32.mrf.mxu0 }
 0x31b   :  { %v1845_v56 = vadd.f32 %v1844_v13, %v1758_v25 }
 0x31d   :  { %1848 = vst [vmem:[#allocation7] sm:$0xff] %v1845_v56 }
 0x31e   :  { %2612 = shalt.err (!%p2609_p0)
}
 0x31f   :  { %1858 = dma.vmem_to_hbm [thread:$0]  %s1856_s29, 128, %s3435_s3, [#allocation4]  }
 0x320   :  { %2625 = dma.done.wait [#allocation4], 128  }
 0x321   :  { %2626 = vsyncadd [#allocation4], 4294967168 }
 0x322   :  { %1862 = vsyncpa [#allocation3], 1 }
 0x323   :  { %1863 = vsyncpa [#allocation6], 1 }
 0x324   :  { %1864 = vsyncpa [#allocation4], 1 }

</bundles_post_ra>
